<compile_context>
chip_gen: v6e
topology: v6e:2x2x1
jax: 0.10.0
libtpu: 0.0.40
codegen_flags: <defaults>
</compile_context>

<pallas_src>
from functools import partial

import jax
import jax.numpy as jnp
from jax import lax
from jax.experimental import pallas as pl
from jax.experimental.pallas import tpu as pltpu

EPS = 1e-5
NEG_SLOPE = 0.1
LANE = 128
BF16_SUBLANE = 16  # bf16 packed sublane tile


def _round_up(x, m):
    return (x + m - 1) // m * m


def _pad_to(x, shape):
    pads = [(0, t - s) for s, t in zip(x.shape, shape)]
    return jnp.pad(x, pads) if any(p for _, p in pads) else x


# --------------------------------------------------------------------------
# Kernel: 4x Linear, 3x (training-mode BatchNorm1d + LeakyReLU 0.1), Sigmoid
# --------------------------------------------------------------------------
def decoder_kernel(z_ref, w1_ref, w2_ref, w3_ref, w4_ref, bn_ref, probs_ref):
    h_p = w1_ref.shape[1]
    d_out_p = w4_ref.shape[1]
    bf = jnp.bfloat16

    def bn_lrelu(x, g_row, bt_row):
        g = bn_ref[g_row:g_row + 1, 0:h_p]       # (1, h_p) static row slice
        bt = bn_ref[bt_row:bt_row + 1, 0:h_p]
        mean = jnp.mean(x, axis=0, keepdims=True)
        xc = x - mean
        var = jnp.mean(xc * xc, axis=0, keepdims=True)   # biased, two-pass
        scale = g * lax.rsqrt(var + EPS)                 # EUP rsqrt
        y = xc * scale + bt                              # 1 vmul + 1 vadd
        return jnp.where(y > 0, y, NEG_SLOPE * y)        # LeakyReLU(0.1)

    h = jnp.dot(z_ref[...], w1_ref[...], preferred_element_type=jnp.float32)
    h = bn_lrelu(h, 0, 1)

    h = jnp.dot(h.astype(bf), w2_ref[...], preferred_element_type=jnp.float32)
    h = bn_lrelu(h, 2, 3)

    h = jnp.dot(h.astype(bf), w3_ref[...], preferred_element_type=jnp.float32)
    h = bn_lrelu(h, 4, 5)

    logits = (jnp.dot(h.astype(bf), w4_ref[...],
                      preferred_element_type=jnp.float32)
              + bn_ref[6:7, 0:d_out_p])
    # Exact sigmoid via tanh: single EUP push, probs strictly in [0, 1].
    probs_ref[...] = 0.5 * jnp.tanh(0.5 * logits) + 0.5


# --------------------------------------------------------------------------
# One-time parameter preparation (hoisted out of the per-call hot path)
# --------------------------------------------------------------------------
def prepare_decoder_params(params, d_in, d_out):
    h = params["w2"].shape[0]
    d_in_p = _round_up(d_in, BF16_SUBLANE)   # K axis: bf16 sublane tile only
    h_p = _round_up(h, LANE)
    d_out_p = _round_up(d_out, LANE)
    w = max(h_p, d_out_p)
    bf = jnp.bfloat16

    prepped = {
        "w1": _pad_to(params["w1"], (d_in_p, h_p)).astype(bf),
        "w2": _pad_to(params["w2"], (h_p, h_p)).astype(bf),
        "w3": _pad_to(params["w3"], (h_p, h_p)).astype(bf),
        "w4": _pad_to(params["w4"], (h_p, d_out_p)).astype(bf),
        # Pack g1,bt1,g2,bt2,g3,bt3,b4 (+ one zero row) into one (8, w) f32
        # array: a single DMA instead of seven tiny ones.  Biases b1-b3 are
        # intentionally dropped (cancelled by training-mode BN mean subtraction).
        "bn": jnp.concatenate(
            [_pad_to(params["g1"], (1, w)), _pad_to(params["bt1"], (1, w)),
             _pad_to(params["g2"], (1, w)), _pad_to(params["bt2"], (1, w)),
             _pad_to(params["g3"], (1, w)), _pad_to(params["bt3"], (1, w)),
             _pad_to(params["b4"], (1, w)), jnp.zeros((1, w), jnp.float32)],
            axis=0),
        "d_out": d_out,
    }
    return prepped


# --------------------------------------------------------------------------
# Forward
# --------------------------------------------------------------------------
@partial(jax.jit, static_argnames=("d_out",))
def _decoder_forward(z, w1, w2, w3, w4, bn, *, d_out):
    bs, d_in = z.shape
    # Training-mode BN needs full-batch statistics; batch stays on the sublane
    # axis, untiled.  For MXU utilization feed bs >= 128 (v5e) / 256 (v6e/v7x).
    assert bs % 8 == 0, "batch must be a sublane multiple (pad batch upstream)"
    d_in_p, h_p = w1.shape
    d_out_p = w4.shape[1]

    z_p = _pad_to(z, (bs, d_in_p)).astype(jnp.bfloat16)

    # VMEM plan: keep everything resident; only raise the scoped limit when the
    # footprint would exceed the conservative default (~16-32 MiB).
    weight_bytes = 2 * (d_in_p * h_p + 2 * h_p * h_p + h_p * d_out_p)
    act_bytes = 8 * 4 * bs * max(h_p, d_out_p) + 4 * 8 * bn.shape[1]
    need = 2 * weight_bytes + act_bytes + (2 << 20)
    compiler_params = None
    if need > (24 << 20):
        # TODO(synk): on v7x (64 MiB physical VMEM) switch to streaming w2/w3/w4
        # from HBM (memory_space=pl.ANY + pltpu.emit_pipeline, f32 VMEM
        # accumulator) instead of raising residency; also add a "parallel"
        # batch grid axis + cross-core BN stat exchange to use both TensorCores.
        compiler_params = pltpu.CompilerParams(
            vmem_limit_bytes=min(int(need * 1.5), 100 << 20))

    vmem = pl.BlockSpec(memory_space=pltpu.MemorySpace.VMEM)
    probs = pl.pallas_call(
        decoder_kernel,
        out_shape=jax.ShapeDtypeStruct((bs, d_out_p), jnp.float32),
        in_specs=[vmem] * 6,
        out_specs=vmem,
        compiler_params=compiler_params,
    )(z_p, w1, w2, w3, w4, bn)

    p = probs[:, :d_out]
    # torch: probs.unsqueeze(2); cat([probs, 1-probs], dim=2) -> (bs, d_out, 2)
    return jnp.stack([p, 1.0 - p], axis=2)


def decoder_forward(z, prepped):
    return _decoder_forward(z, prepped["w1"], prepped["w2"], prepped["w3"],
                            prepped["w4"], prepped["bn"], d_out=prepped["d_out"])


# --------------------------------------------------------------------------
# Parameters (torch-equivalent shapes; weights stored transposed as (in, out))
# --------------------------------------------------------------------------
def make_decoder_params(key, d_in, d_out):
    c = 2
    h = d_in * 4 * c
    dims = [(d_in, h), (h, h), (h, h), (h, d_out)]
    params = {}
    for li, (din, dout) in enumerate(dims, start=1):
        key, kw, kb = jax.random.split(key, 3)
        bound = 1.0 / float(din) ** 0.5
        params[f"w{li}"] = jax.random.uniform(kw, (din, dout), jnp.float32,
                                              -bound, bound)
        params[f"b{li}"] = jax.random.uniform(kb, (1, dout), jnp.float32,
                                              -bound, bound)
    for li in (1, 2, 3):
        key, kg, kbt = jax.random.split(key, 3)
        params[f"g{li}"] = 1.0 + 0.1 * jax.random.normal(kg, (1, h), jnp.float32)
        params[f"bt{li}"] = 0.1 * jax.random.normal(kbt, (1, h), jnp.float32)
    return params


# --------------------------------------------------------------------------
# References
# --------------------------------------------------------------------------
def decoder_reference_f32(z, params):
    """Torch-semantics reference (f32 everywhere, biases b1-b3 included)."""
    def bn_lrelu(x, g, bt):
        mean = jnp.mean(x, axis=0, keepdims=True)
        var = jnp.mean((x - mean) ** 2, axis=0, keepdims=True)
        y = g * (x - mean) / jnp.sqrt(var + EPS) + bt
        return jnp.where(y > 0, y, NEG_SLOPE * y)

    h = bn_lrelu(z @ params["w1"] + params["b1"], params["g1"], params["bt1"])
    h = bn_lrelu(h @ params["w2"] + params["b2"], params["g2"], params["bt2"])
    h = bn_lrelu(h @ params["w3"] + params["b3"], params["g3"], params["bt3"])
    p = jax.nn.sigmoid(h @ params["w4"] + params["b4"])
    return jnp.stack([p, 1.0 - p], axis=2)


def decoder_reference_bf16(z, params):
    """Mirrors the kernel's numerics: bf16 dot operands, fused BN, no b1-b3."""
    bf = jnp.bfloat16

    def dot(a, w):
        return jnp.dot(a.astype(bf), w.astype(bf),
                       preferred_element_type=jnp.float32)

    def bn_lrelu(x, g, bt):
        mean = jnp.mean(x, axis=0, keepdims=True)
        xc = x - mean
        var = jnp.mean(xc * xc, axis=0, keepdims=True)
        y = xc * (g * lax.rsqrt(var + EPS)) + bt
        return jnp.where(y > 0, y, NEG_SLOPE * y)

    h = bn_lrelu(dot(z, params["w1"]), params["g1"], params["bt1"])
    h = bn_lrelu(dot(h, params["w2"]), params["g2"], params["bt2"])
    h = bn_lrelu(dot(h, params["w3"]), params["g3"], params["bt3"])
    logits = dot(h, params["w4"]) + params["b4"]
    p = 0.5 * jnp.tanh(0.5 * logits) + 0.5
    return jnp.stack([p, 1.0 - p], axis=2)


# --------------------------------------------------------------------------
if __name__ == "__main__":
    # d_in=8 -> hidden = 8*4*2 = 64, d_out=16, batch = 8 (sublane multiple)
    bs, d_in, d_out = 8, 8, 16

    key = jax.random.PRNGKey(0)
    key, kz = jax.random.split(key)
    z = jax.random.normal(kz, (bs, d_in), jnp.float32)
    params = make_decoder_params(key, d_in, d_out)

    prepped = prepare_decoder_params(params, d_in, d_out)  # one-time prep
    out = jax.block_until_ready(decoder_forward(z, prepped))

    assert out.shape == (bs, d_out, 2), out.shape
    # converse channel is exactly 1 - probs; probs bounded in [0, 1]
    assert jnp.array_equal(out[..., 1], 1.0 - out[..., 0])
    assert float(jnp.min(out)) >= 0.0 and float(jnp.max(out)) <= 1.0

    # Check vs. a reference mirroring the kernel's numerics (bf16 MXU inputs,
    # fused BN, bias drop, tanh-sigmoid); tolerance covers accumulation-order
    # and transcendental-implementation differences only.
    ref_bf16 = decoder_reference_bf16(z, params)
    err_bf16 = float(jnp.max(jnp.abs(out - ref_bf16)))
    assert err_bf16 < 1e-2, f"kernel vs bf16 reference max abs err {err_bf16}"

    # Semantic check vs. the full-f32 torch-equivalent reference (includes the
    # mathematically-no-op biases b1-b3); tolerance covers bf16 matmul inputs.
    ref_f32 = decoder_reference_f32(z, params)
    err_f32 = float(jnp.max(jnp.abs(out - ref_f32)))
    assert err_f32 < 5e-2, f"kernel vs f32 reference max abs err {err_f32}"

    print("KERNEL_OK")
</pallas_src>

<mosaic_0001>
module attributes {stable_mosaic.version = 11 : i64} {
  func.func @decoder_kernel(%arg0: memref<8x16xbf16, #tpu.memory_space<vmem>>, %arg1: memref<16x128xbf16, #tpu.memory_space<vmem>>, %arg2: memref<128x128xbf16, #tpu.memory_space<vmem>>, %arg3: memref<128x128xbf16, #tpu.memory_space<vmem>>, %arg4: memref<128x128xbf16, #tpu.memory_space<vmem>>, %arg5: memref<8x128xf32, #tpu.memory_space<vmem>>, %arg6: memref<8x128xf32, #tpu.memory_space<vmem>>) attributes {dimension_semantics = [], scalar_prefetch = 0 : i64, scratch_operands = 0 : i64, tpu.core_type = #tpu.core_type<tc>} {
    %c0 = arith.constant 0 : index
    %c0_0 = arith.constant 0 : index
    %0 = vector.load %arg0[%c0, %c0_0] : memref<8x16xbf16, #tpu.memory_space<vmem>>, vector<8x16xbf16>
    %c0_1 = arith.constant 0 : index
    %c0_2 = arith.constant 0 : index
    %1 = vector.load %arg1[%c0_1, %c0_2] : memref<16x128xbf16, #tpu.memory_space<vmem>>, vector<16x128xbf16>
    %cst = arith.constant dense<0.000000e+00> : vector<8x128xf32>
    %2 = tpu.matmul %0, %1, %cst {dimension_numbers = #tpu.dot_dimension_numbers<[1], [0], [0], [1], [0, 0, 1, 1], [], []>} : vector<8x16xbf16>, vector<16x128xbf16>, vector<8x128xf32> -> vector<8x128xf32>
    %c0_3 = arith.constant 0 : index
    %c0_4 = arith.constant 0 : index
    %3 = vector.load %arg5[%c0_3, %c0_4] : memref<8x128xf32, #tpu.memory_space<vmem>>, vector<1x128xf32>
    %c1 = arith.constant 1 : index
    %c0_5 = arith.constant 0 : index
    %4 = vector.load %arg5[%c1, %c0_5] : memref<8x128xf32, #tpu.memory_space<vmem>>, vector<1x128xf32>
    %cst_6 = arith.constant dense<0.000000e+00> : vector<128xf32>
    %5 = vector.multi_reduction <add>, %2, %cst_6 [0] : vector<8x128xf32> to vector<128xf32>
    %6 = vector.shape_cast %5 : vector<128xf32> to vector<1x128xf32>
    %cst_7 = arith.constant 8.000000e+00 : f32
    %7 = vector.broadcast %cst_7 : f32 to vector<1x128xf32>
    %8 = arith.divf %6, %7 : vector<1x128xf32>
    %9 = vector.broadcast %8 : vector<1x128xf32> to vector<8x128xf32>
    %10 = arith.subf %2, %9 : vector<8x128xf32>
    %11 = arith.mulf %10, %10 : vector<8x128xf32>
    %cst_8 = arith.constant dense<0.000000e+00> : vector<128xf32>
    %12 = vector.multi_reduction <add>, %11, %cst_8 [0] : vector<8x128xf32> to vector<128xf32>
    %13 = vector.shape_cast %12 : vector<128xf32> to vector<1x128xf32>
    %cst_9 = arith.constant 8.000000e+00 : f32
    %14 = vector.broadcast %cst_9 : f32 to vector<1x128xf32>
    %15 = arith.divf %13, %14 : vector<1x128xf32>
    %cst_10 = arith.constant 9.99999974E-6 : f32
    %16 = vector.broadcast %cst_10 : f32 to vector<1x128xf32>
    %17 = arith.addf %15, %16 : vector<1x128xf32>
    %18 = math.rsqrt %17 : vector<1x128xf32>
    %19 = arith.mulf %3, %18 : vector<1x128xf32>
    %20 = vector.broadcast %19 : vector<1x128xf32> to vector<8x128xf32>
    %21 = arith.mulf %10, %20 : vector<8x128xf32>
    %22 = vector.broadcast %4 : vector<1x128xf32> to vector<8x128xf32>
    %23 = arith.addf %21, %22 : vector<8x128xf32>
    %cst_11 = arith.constant 0.000000e+00 : f32
    %24 = vector.broadcast %cst_11 : f32 to vector<8x128xf32>
    %25 = arith.cmpf ogt, %23, %24 : vector<8x128xf32>
    %cst_12 = arith.constant 1.000000e-01 : f32
    %26 = vector.broadcast %cst_12 : f32 to vector<8x128xf32>
    %27 = arith.mulf %26, %23 : vector<8x128xf32>
    %28 = arith.select %25, %23, %27 : vector<8x128xi1>, vector<8x128xf32>
    %29 = arith.truncf %28 : vector<8x128xf32> to vector<8x128xbf16>
    %c0_13 = arith.constant 0 : index
    %c0_14 = arith.constant 0 : index
    %30 = vector.load %arg2[%c0_13, %c0_14] : memref<128x128xbf16, #tpu.memory_space<vmem>>, vector<128x128xbf16>
    %cst_15 = arith.constant dense<0.000000e+00> : vector<8x128xf32>
    %31 = tpu.matmul %29, %30, %cst_15 {dimension_numbers = #tpu.dot_dimension_numbers<[1], [0], [0], [1], [0, 0, 1, 1], [], []>} : vector<8x128xbf16>, vector<128x128xbf16>, vector<8x128xf32> -> vector<8x128xf32>
    %c2 = arith.constant 2 : index
    %c0_16 = arith.constant 0 : index
    %32 = vector.load %arg5[%c2, %c0_16] : memref<8x128xf32, #tpu.memory_space<vmem>>, vector<1x128xf32>
    %c3 = arith.constant 3 : index
    %c0_17 = arith.constant 0 : index
    %33 = vector.load %arg5[%c3, %c0_17] : memref<8x128xf32, #tpu.memory_space<vmem>>, vector<1x128xf32>
    %cst_18 = arith.constant dense<0.000000e+00> : vector<128xf32>
    %34 = vector.multi_reduction <add>, %31, %cst_18 [0] : vector<8x128xf32> to vector<128xf32>
    %35 = vector.shape_cast %34 : vector<128xf32> to vector<1x128xf32>
    %cst_19 = arith.constant 8.000000e+00 : f32
    %36 = vector.broadcast %cst_19 : f32 to vector<1x128xf32>
    %37 = arith.divf %35, %36 : vector<1x128xf32>
    %38 = vector.broadcast %37 : vector<1x128xf32> to vector<8x128xf32>
    %39 = arith.subf %31, %38 : vector<8x128xf32>
    %40 = arith.mulf %39, %39 : vector<8x128xf32>
    %cst_20 = arith.constant dense<0.000000e+00> : vector<128xf32>
    %41 = vector.multi_reduction <add>, %40, %cst_20 [0] : vector<8x128xf32> to vector<128xf32>
    %42 = vector.shape_cast %41 : vector<128xf32> to vector<1x128xf32>
    %cst_21 = arith.constant 8.000000e+00 : f32
    %43 = vector.broadcast %cst_21 : f32 to vector<1x128xf32>
    %44 = arith.divf %42, %43 : vector<1x128xf32>
    %cst_22 = arith.constant 9.99999974E-6 : f32
    %45 = vector.broadcast %cst_22 : f32 to vector<1x128xf32>
    %46 = arith.addf %44, %45 : vector<1x128xf32>
    %47 = math.rsqrt %46 : vector<1x128xf32>
    %48 = arith.mulf %32, %47 : vector<1x128xf32>
    %49 = vector.broadcast %48 : vector<1x128xf32> to vector<8x128xf32>
    %50 = arith.mulf %39, %49 : vector<8x128xf32>
    %51 = vector.broadcast %33 : vector<1x128xf32> to vector<8x128xf32>
    %52 = arith.addf %50, %51 : vector<8x128xf32>
    %cst_23 = arith.constant 0.000000e+00 : f32
    %53 = vector.broadcast %cst_23 : f32 to vector<8x128xf32>
    %54 = arith.cmpf ogt, %52, %53 : vector<8x128xf32>
    %cst_24 = arith.constant 1.000000e-01 : f32
    %55 = vector.broadcast %cst_24 : f32 to vector<8x128xf32>
    %56 = arith.mulf %55, %52 : vector<8x128xf32>
    %57 = arith.select %54, %52, %56 : vector<8x128xi1>, vector<8x128xf32>
    %58 = arith.truncf %57 : vector<8x128xf32> to vector<8x128xbf16>
    %c0_25 = arith.constant 0 : index
    %c0_26 = arith.constant 0 : index
    %59 = vector.load %arg3[%c0_25, %c0_26] : memref<128x128xbf16, #tpu.memory_space<vmem>>, vector<128x128xbf16>
    %cst_27 = arith.constant dense<0.000000e+00> : vector<8x128xf32>
    %60 = tpu.matmul %58, %59, %cst_27 {dimension_numbers = #tpu.dot_dimension_numbers<[1], [0], [0], [1], [0, 0, 1, 1], [], []>} : vector<8x128xbf16>, vector<128x128xbf16>, vector<8x128xf32> -> vector<8x128xf32>
    %c4 = arith.constant 4 : index
    %c0_28 = arith.constant 0 : index
    %61 = vector.load %arg5[%c4, %c0_28] : memref<8x128xf32, #tpu.memory_space<vmem>>, vector<1x128xf32>
    %c5 = arith.constant 5 : index
    %c0_29 = arith.constant 0 : index
    %62 = vector.load %arg5[%c5, %c0_29] : memref<8x128xf32, #tpu.memory_space<vmem>>, vector<1x128xf32>
    %cst_30 = arith.constant dense<0.000000e+00> : vector<128xf32>
    %63 = vector.multi_reduction <add>, %60, %cst_30 [0] : vector<8x128xf32> to vector<128xf32>
    %64 = vector.shape_cast %63 : vector<128xf32> to vector<1x128xf32>
    %cst_31 = arith.constant 8.000000e+00 : f32
    %65 = vector.broadcast %cst_31 : f32 to vector<1x128xf32>
    %66 = arith.divf %64, %65 : vector<1x128xf32>
    %67 = vector.broadcast %66 : vector<1x128xf32> to vector<8x128xf32>
    %68 = arith.subf %60, %67 : vector<8x128xf32>
    %69 = arith.mulf %68, %68 : vector<8x128xf32>
    %cst_32 = arith.constant dense<0.000000e+00> : vector<128xf32>
    %70 = vector.multi_reduction <add>, %69, %cst_32 [0] : vector<8x128xf32> to vector<128xf32>
    %71 = vector.shape_cast %70 : vector<128xf32> to vector<1x128xf32>
    %cst_33 = arith.constant 8.000000e+00 : f32
    %72 = vector.broadcast %cst_33 : f32 to vector<1x128xf32>
    %73 = arith.divf %71, %72 : vector<1x128xf32>
    %cst_34 = arith.constant 9.99999974E-6 : f32
    %74 = vector.broadcast %cst_34 : f32 to vector<1x128xf32>
    %75 = arith.addf %73, %74 : vector<1x128xf32>
    %76 = math.rsqrt %75 : vector<1x128xf32>
    %77 = arith.mulf %61, %76 : vector<1x128xf32>
    %78 = vector.broadcast %77 : vector<1x128xf32> to vector<8x128xf32>
    %79 = arith.mulf %68, %78 : vector<8x128xf32>
    %80 = vector.broadcast %62 : vector<1x128xf32> to vector<8x128xf32>
    %81 = arith.addf %79, %80 : vector<8x128xf32>
    %cst_35 = arith.constant 0.000000e+00 : f32
    %82 = vector.broadcast %cst_35 : f32 to vector<8x128xf32>
    %83 = arith.cmpf ogt, %81, %82 : vector<8x128xf32>
    %cst_36 = arith.constant 1.000000e-01 : f32
    %84 = vector.broadcast %cst_36 : f32 to vector<8x128xf32>
    %85 = arith.mulf %84, %81 : vector<8x128xf32>
    %86 = arith.select %83, %81, %85 : vector<8x128xi1>, vector<8x128xf32>
    %87 = arith.truncf %86 : vector<8x128xf32> to vector<8x128xbf16>
    %c0_37 = arith.constant 0 : index
    %c0_38 = arith.constant 0 : index
    %88 = vector.load %arg4[%c0_37, %c0_38] : memref<128x128xbf16, #tpu.memory_space<vmem>>, vector<128x128xbf16>
    %cst_39 = arith.constant dense<0.000000e+00> : vector<8x128xf32>
    %89 = tpu.matmul %87, %88, %cst_39 {dimension_numbers = #tpu.dot_dimension_numbers<[1], [0], [0], [1], [0, 0, 1, 1], [], []>} : vector<8x128xbf16>, vector<128x128xbf16>, vector<8x128xf32> -> vector<8x128xf32>
    %c6 = arith.constant 6 : index
    %c0_40 = arith.constant 0 : index
    %90 = vector.load %arg5[%c6, %c0_40] : memref<8x128xf32, #tpu.memory_space<vmem>>, vector<1x128xf32>
    %91 = vector.broadcast %90 : vector<1x128xf32> to vector<8x128xf32>
    %92 = arith.addf %89, %91 : vector<8x128xf32>
    %cst_41 = arith.constant 5.000000e-01 : f32
    %93 = vector.broadcast %cst_41 : f32 to vector<8x128xf32>
    %94 = arith.mulf %93, %92 : vector<8x128xf32>
    %95 = math.tanh %94 : vector<8x128xf32>
    %cst_42 = arith.constant 5.000000e-01 : f32
    %96 = vector.broadcast %cst_42 : f32 to vector<8x128xf32>
    %97 = arith.mulf %96, %95 : vector<8x128xf32>
    %cst_43 = arith.constant 5.000000e-01 : f32
    %98 = vector.broadcast %cst_43 : f32 to vector<8x128xf32>
    %99 = arith.addf %97, %98 : vector<8x128xf32>
    %c0_44 = arith.constant 0 : index
    %c0_45 = arith.constant 0 : index
    %100 = vector.load %arg6[%c0_44, %c0_45] : memref<8x128xf32, #tpu.memory_space<vmem>>, vector<8x128xf32>
    tpu.vector_store %arg6[%c0_44, %c0_45], %99 {strides = array<i32>} : memref<8x128xf32, #tpu.memory_space<vmem>>, vector<8x128xf32>,
    return
  }
}

</mosaic_0001>

<bundles_post_ra>
// kernel: _decoder_forward.1
= control target key start
LH: loop header
LB: loop body
LE: loop exit
PB: predicated region body
PF: predicated region fallthrough
CT: control target
= control target key end

     0   :  { %11 = vsyncpa [#allocation3], 0  ;;  %s900_s0 = inlined_call_operand.vmem [shape: bf16[8,16], index: 0, kind: input, shape index: {}]   ;;  %s901_s1 = inlined_call_operand.vmem [shape: bf16[16,128], index: 1, kind: input, shape index: {}]   ;;  %s902_s2 = inlined_call_operand.hbm [shape: bf16[128,128], index: 2, kind: input, shape index: {}]   ;;  %s903_s3 = inlined_call_operand.hbm [shape: bf16[128,128], index: 3, kind: input, shape index: {}]   ;;  %s904_s4 = inlined_call_operand.hbm [shape: bf16[128,128], index: 4, kind: input, shape index: {}]   ;;  %s905_s5 = inlined_call_operand.vmem [shape: f32[8,128], index: 5, kind: input, shape index: {}]   ;;  %s906_s6 = inlined_call_operand.vmem [shape: f32[8,128], index: 6, kind: output, shape index: {}]  }
   0x1   :  { %12 = vsyncpa [#allocation5], 0  ;;  %s781_s21 = smov [#allocation4]   ;;  %s782_s23 = smov [#allocation2]  }
   0x2   :  { %s34_s22 = sshll.u32 %s781_s21, 4  ;;  %s22_s24 = sshll.u32 %s782_s23, 4  ;;  %s35_s22 = int_to_ptr.vmem [resolvable:$true] %s34_s22  ;;  %s23_s24 = int_to_ptr.vmem [resolvable:$true] %s22_s24 }
   0x3   :  { %s725_s25 = scalar_lea.vmem %s35_s22, 1024  ;;  %p730_p1 = scmp.lt.s32.totalorder %s35_s22, %s35_s22 }
   0x4   :  { %p726_p0 = scmp.ne.s32.totalorder %s35_s22, %s725_s25  ;;  %p731_p2 = scmp.lt.s32.totalorder %s725_s25, %s725_s25 }
   0x6   :  { %p732_p3 = por %p731_p2, %p730_p1 }
   0x8   :  { %p733_p4 = pnand %p732_p3, %p726_p0 }
   0xa   :  { %736 = shalt.err (!%p733_p4)
}
   0xb   :  { %s783_s26 = smov 64   ;;  %s784_s27 = smov 4  }
   0xc   :  { %40 = dma.hbm_to_vmem [thread:$0]  %s903_s3, 1024, %s35_s22, [#allocation5], %s783_s26, %s783_s26, %s784_s27  }
   0xd   :  { %s745_s30 = scalar_lea.vmem %s23_s24, 1024  ;;  %p750_p6 = scmp.lt.s32.totalorder %s23_s24, %s23_s24 }
   0xe   :  { %p746_p5 = scmp.ne.s32.totalorder %s23_s24, %s745_s30  ;;  %p751_p7 = scmp.lt.s32.totalorder %s745_s30, %s745_s30 }
  0x10   :  { %p752_p8 = por %p751_p7, %p750_p6 }
  0x12   :  { %p753_p9 = pnand %p752_p8, %p746_p5 }
  0x14   :  { %756 = shalt.err (!%p753_p9)
}
  0x15   :  { %28 = dma.hbm_to_vmem [thread:$0]  %s902_s2, 1024, %s23_s24, [#allocation3], %s783_s26, %s783_s26, %s784_s27  }
  0x16   :  { %s785_s9 = smov [#allocation6]  }
  0x17   :  { %s46_s10 = sshll.u32 %s785_s9, 4  ;;  %s47_s10 = int_to_ptr.vmem [resolvable:$true] %s46_s10 }
  0x18   :  { %s765_s11 = scalar_lea.vmem %s47_s10, 1024  ;;  %p770_p11 = scmp.lt.s32.totalorder %s47_s10, %s47_s10 }
  0x19   :  { %p766_p10 = scmp.ne.s32.totalorder %s47_s10, %s765_s11  ;;  %p771_p12 = scmp.lt.s32.totalorder %s765_s11, %s765_s11 }
  0x1b   :  { %p772_p13 = por %p771_p12, %p770_p11 }
  0x1d   :  { %p773_p0 = pnand %p772_p13, %p766_p10 }
  0x1f   :  { %776 = shalt.err (!%p773_p0)
}
  0x20   :  { %52 = dma.hbm_to_vmem [thread:$0]  %s904_s4, 1024, %s47_s10, [#allocation5], %s783_s26, %s783_s26, %s784_s27  }
  0x21   :  { %777 = dma.done.wait [#allocation3], 1024  }
  0x22   :  { %778 = vsyncadd [#allocation3], 4294966272 }
  0x23   :  { %779 = dma.done.wait [#allocation5], 2048  }
  0x24   :  { %780 = vsyncadd [#allocation5], 4294965248  ;;  %v786_v0 = vmov 0.0   ;;  %vm787_vm0 = vmmov 0   ;;  %v684_v1 = vld [vmem:[%s901_s1] sm:$0xff]   ;;  %vm74_vm1 = vcmask 130048   ;;  %v140_v32 = vlaneseq }
  0x25   :  { %611 = vmatprep.subr.bf16.mxu0 %v786_v0  ;;  %613 = vmatprep.mubr.msk.bf16.mxu0 %vm787_vm0, %v786_v0  ;;  %v65_v2 = vld [vmem:[%s900_s0] sm:$0xf]  ;;  %v685_v3 = vld [vmem:[#allocation2 + $0x38] sm:$0xff]   ;;  %v686_v4 = vld [vmem:[#allocation2 + $0x30] sm:$0xff]  }
  0x26   :  { %617 = vmatprep.subr.bf16.mxu1 %v786_v0  ;;  %633 = vmatprep.mubr.msk.bf16.mxu1 %vm787_vm0, %v786_v0  ;;  %v687_v5 = vld [vmem:[#allocation2 + $0x28] sm:$0xff]   ;;  %v688_v6 = vld [vmem:[#allocation2 + $0x20] sm:$0xff]   ;;  %v689_v7 = vld [vmem:[#allocation2 + $0x18] sm:$0xff]   ;;  %v141_v33 = vshrl.u32 %v140_v32, 7 }
  0x27   :  { %612 = vmatpush3.bf16.msra.mxu0 %v684_v1  ;;  %618 = vmatpush3.bf16.msra.mxu1 %v685_v3  ;;  %v690_v8 = vld [vmem:[#allocation2 + $0x10] sm:$0xff]   ;;  %v691_v9 = vld [vmem:[#allocation2 + $0x8] sm:$0xff]   ;;  %v692_v10 = vld [vmem:[#allocation2] sm:$0xff]  }
  0x28   :  { %637 = vmatprep.subr.bf16.mxu0 %v786_v0  ;;  %619 = vmatprep.subr.bf16.mxu1 %v786_v0  ;;  %v118_v34 = vld [vmem:[%s905_s5] sm:$0x1]  ;;  %v858_v35 = vsub.s32 0, %v141_v33  ;;  %v554_v39 = vld [vmem:[%s905_s5 + $0x1] ss:$0 sm:$0xff]  ;;  %v693_v45 = vld [vmem:[#allocation4 + $0x38] sm:$0xff]  }
  0x29   :  { %v694_v46 = vld [vmem:[#allocation4 + $0x30] sm:$0xff]   ;;  %v695_v47 = vld [vmem:[#allocation4 + $0x28] sm:$0xff]   ;;  %v696_v48 = vld [vmem:[#allocation4 + $0x20] sm:$0xff]  }
  0x2a   :  { %614 = vmatmul.mubr.msk.bf16.vlgmr.msra.gmra.mxu0 %vm74_vm1, %v65_v2  ;;  %v697_v49 = vld [vmem:[#allocation4 + $0x18] sm:$0xff]   ;;  %v698_v50 = vld [vmem:[#allocation4 + $0x10] sm:$0xff]   ;;  %v699_v51 = vld [vmem:[#allocation4 + $0x8] sm:$0xff]  }
  0x2b   :  { %653 = vmatprep.mubr.msk.bf16.mxu0 %vm787_vm0, %v786_v0  ;;  %620 = vmatpush3.bf16.msra.mxu1 %v686_v4  ;;  %v700_v52 = vld [vmem:[#allocation4] sm:$0xff]  }
  0x2c   :  { %621 = vmatprep.subr.bf16.mxu1 %v786_v0  ;;  %638 = vmatpush3.bf16.msra.mxu0 %v693_v45 }
  0x2d   :  { %639 = vmatprep.subr.bf16.mxu0 %v786_v0 }
  0x2f   :  { %622 = vmatpush3.bf16.msra.mxu1 %v687_v5 }
  0x30   :  { %623 = vmatprep.subr.bf16.mxu1 %v786_v0  ;;  %640 = vmatpush3.bf16.msra.mxu0 %v694_v46 }
  0x31   :  { %641 = vmatprep.subr.bf16.mxu0 %v786_v0 }
  0x33   :  { %624 = vmatpush3.bf16.msra.mxu1 %v688_v6 }
  0x34   :  { %625 = vmatprep.subr.bf16.mxu1 %v786_v0  ;;  %642 = vmatpush3.bf16.msra.mxu0 %v695_v47 }
  0x35   :  { %643 = vmatprep.subr.bf16.mxu0 %v786_v0 }
  0x37   :  { %626 = vmatpush3.bf16.msra.mxu1 %v689_v7 }
  0x38   :  { %627 = vmatprep.subr.bf16.mxu1 %v786_v0  ;;  %644 = vmatpush3.bf16.msra.mxu0 %v696_v48 }
  0x39   :  { %645 = vmatprep.subr.bf16.mxu0 %v786_v0 }
  0x3b   :  { %628 = vmatpush3.bf16.msra.mxu1 %v690_v8 }
  0x3c   :  { %629 = vmatprep.subr.bf16.mxu1 %v786_v0  ;;  %646 = vmatpush3.bf16.msra.mxu0 %v697_v49 }
  0x3d   :  { %647 = vmatprep.subr.bf16.mxu0 %v786_v0 }
  0x3f   :  { %630 = vmatpush3.bf16.msra.mxu1 %v691_v9 }
  0x40   :  { %631 = vmatprep.subr.bf16.mxu1 %v786_v0  ;;  %648 = vmatpush3.bf16.msra.mxu0 %v698_v50  ;;  %v397_v50 = vld [vmem:[%s905_s5 + $0x4] sm:$0x1] }
  0x41   :  { %649 = vmatprep.subr.bf16.mxu0 %v786_v0 }
  0x43   :  { %632 = vmatpush3.bf16.msra.mxu1 %v692_v10 }
  0x44   :  { %657 = vmatprep.subr.bf16.mxu1 %v786_v0  ;;  %650 = vmatpush3.bf16.msra.mxu0 %v699_v51 }
  0x45   :  { %651 = vmatprep.subr.bf16.mxu0 %v786_v0 }
  0x48   :  { %652 = vmatpush3.bf16.msra.mxu0 %v700_v52 }
  0xea   :  { %v112_v11 = vpop.f32.mrf.mxu0 }
  0xeb   :  { %v120_v12 = vrot.slane %v112_v11, 4 }
  0xec   :  { %v615_v13 = vpop.f32.mrf.mxu0 }
  0xed   :  { %v121_v14 = vadd.f32 %v120_v12, %v112_v11 }
  0xee   :  { %v115_v15 = vpop.f32.mrf.mxu0 }
  0xef   :  { %v122_v16 = vrot.slane %v121_v14, 2  ;;  %v563_v15 = vld [vmem:[%s905_s5 + $0x3] ss:$0 sm:$0xff] }
  0xf0   :  { %v616_v17 = vpop.f32.mrf.mxu0 }
  0xf1   :  { %v123_v18 = vadd.f32 %v122_v16, %v121_v14 }
  0xf3   :  { %v124_v19 = vrot.slane %v123_v18, 1 }
  0xf5   :  { %v125_v20 = vadd.f32 %v124_v19, %v123_v18 }
  0xf7   :  { %v127_v21 = vmul.f32 0.125, %v125_v20 }
  0xf9   :  { %v128_v22 = vsub.f32 %v112_v11, %v127_v21  ;;  %v258_v11 = vld [vmem:[%s905_s5 + $0x2] sm:$0x1]  ;;  %v701_v21 = vld [vmem:[#allocation6 + $0x38] sm:$0xff]  }
  0xfb   :  { %v129_v23 = vmul.f32 %v128_v22, %v128_v22 }
  0xfd   :  { %v130_v24 = vrot.slane %v129_v23, 4 }
  0xff   :  { %v131_v25 = vadd.f32 %v130_v24, %v129_v23  ;;  %v703_v23 = vld [vmem:[#allocation6 + $0x28] sm:$0xff]   ;;  %v704_v24 = vld [vmem:[#allocation6 + $0x20] sm:$0xff]  }
 0x101   :  { %v132_v26 = vrot.slane %v131_v25, 2 }
 0x103   :  { %v133_v27 = vadd.f32 %v132_v26, %v131_v25  ;;  %v705_v25 = vld [vmem:[#allocation6 + $0x18] sm:$0xff]   ;;  %v706_v26 = vld [vmem:[#allocation6 + $0x10] sm:$0xff]  }
 0x105   :  { %v134_v28 = vrot.slane %v133_v27, 1 }
 0x107   :  { %v135_v29 = vadd.f32 %v134_v28, %v133_v27  ;;  %v707_v27 = vld [vmem:[#allocation6 + $0x8] sm:$0xff]   ;;  %v708_v28 = vld [vmem:[#allocation6] sm:$0xff]  }
 0x109   :  { %v136_v30 = vmul.f32 0.125, %v135_v29 }
 0x10b   :  { %v137_v31 = vadd.f32 1e-05, %v136_v30 }
 0x10d   :  { %709 = vrsqrt.f32 %v137_v31 }
 0x11a   :  { %v710_v36 = vpop.eup %709 }
 0x11b   :  { %v139_v37 = vmul.f32 %v710_v36, %v118_v34 }
 0x11d   :  { %v143_v38 = vrot.slane %v139_v37, %v858_v35 }
 0x11f   :  { %v144_v40 = vmul.f32 %v143_v38, %v128_v22  ;;  %v702_v22 = vld [vmem:[#allocation6 + $0x30] sm:$0xff]  }
 0x121   :  { %v149_v41 = vadd.f32 %v554_v39, %v144_v40 }
 0x123   :  { %vm150_vm2 = vcmp.gt.f32.partialorder %v149_v41, 0.0  ;;  %v151_v42 = vmul.f32 0.1, %v149_v41 }
 0x125   :  { %v152_v43 = vsel %vm150_vm2, %v149_v41, %v151_v42 }
 0x126   :  { %v153_v44 = vpack.c.bf16 %v152_v43, %v152_v43 }
 0x128   :  { %634 = vmatmul.mubr.bf16.vlgmr.msra.gmra.mxu1 %v153_v44 }
 0x129   :  { %673 = vmatprep.mubr.msk.bf16.mxu1 %vm787_vm0, %v786_v0  ;;  %658 = vmatpush3.bf16.msra.mxu1 %v701_v21 }
 0x12a   :  { %659 = vmatprep.subr.bf16.mxu1 %v786_v0 }
 0x12d   :  { %660 = vmatpush3.bf16.msra.mxu1 %v702_v22 }
 0x12e   :  { %661 = vmatprep.subr.bf16.mxu1 %v786_v0 }
 0x131   :  { %662 = vmatpush3.bf16.msra.mxu1 %v703_v23 }
 0x132   :  { %663 = vmatprep.subr.bf16.mxu1 %v786_v0 }
 0x135   :  { %664 = vmatpush3.bf16.msra.mxu1 %v704_v24 }
 0x136   :  { %665 = vmatprep.subr.bf16.mxu1 %v786_v0 }
 0x139   :  { %666 = vmatpush3.bf16.msra.mxu1 %v705_v25 }
 0x13a   :  { %667 = vmatprep.subr.bf16.mxu1 %v786_v0 }
 0x13d   :  { %668 = vmatpush3.bf16.msra.mxu1 %v706_v26 }
 0x13e   :  { %669 = vmatprep.subr.bf16.mxu1 %v786_v0 }
 0x141   :  { %670 = vmatpush3.bf16.msra.mxu1 %v707_v27 }
 0x142   :  { %671 = vmatprep.subr.bf16.mxu1 %v786_v0 }
 0x145   :  { %672 = vmatpush3.bf16.msra.mxu1 %v708_v28 }
 0x1e8   :  { %v252_v53 = vpop.f32.mrf.mxu1 }
 0x1e9   :  { %v260_v54 = vrot.slane %v252_v53, 4 }
 0x1ea   :  { %v635_v55 = vpop.f32.mrf.mxu1 }
 0x1eb   :  { %v261_v56 = vadd.f32 %v260_v54, %v252_v53  ;;  %v572_v54 = vld [vmem:[%s905_s5 + $0x5] ss:$0 sm:$0xff] }
 0x1ec   :  { %v255_v57 = vpop.f32.mrf.mxu1 }
 0x1ed   :  { %v262_v58 = vrot.slane %v261_v56, 2 }
 0x1ee   :  { %v636_v59 = vpop.f32.mrf.mxu1 }
 0x1ef   :  { %v263_v60 = vadd.f32 %v262_v58, %v261_v56 }
 0x1f1   :  { %v264_v61 = vrot.slane %v263_v60, 1 }
 0x1f3   :  { %v265_v62 = vadd.f32 %v264_v61, %v263_v60  ;;  %v573_v60 = vld [vmem:[%s905_s5 + $0x6] ss:$0 sm:$0xff] }
 0x1f5   :  { %v266_v63 = vmul.f32 0.125, %v265_v62 }
 0x1f7   :  { %v267_v1 = vsub.f32 %v252_v53, %v266_v63 }
 0x1f9   :  { %v268_v2 = vmul.f32 %v267_v1, %v267_v1 }
 0x1fb   :  { %v269_v3 = vrot.slane %v268_v2, 4 }
 0x1fd   :  { %v270_v4 = vadd.f32 %v269_v3, %v268_v2 }
 0x1ff   :  { %v271_v5 = vrot.slane %v270_v4, 2 }
 0x201   :  { %v272_v6 = vadd.f32 %v271_v5, %v270_v4 }
 0x203   :  { %v273_v7 = vrot.slane %v272_v6, 1 }
 0x205   :  { %v274_v8 = vadd.f32 %v273_v7, %v272_v6 }
 0x207   :  { %v275_v9 = vmul.f32 0.125, %v274_v8 }
 0x209   :  { %v276_v10 = vadd.f32 1e-05, %v275_v9 }
 0x20b   :  { %711 = vrsqrt.f32 %v276_v10 }
 0x218   :  { %v712_v12 = vpop.eup %711 }
 0x219   :  { %v278_v13 = vmul.f32 %v712_v12, %v258_v11 }
 0x21b   :  { %v282_v14 = vrot.slane %v278_v13, %v858_v35 }
 0x21d   :  { %v283_v16 = vmul.f32 %v282_v14, %v267_v1 }
 0x21f   :  { %v288_v17 = vadd.f32 %v563_v15, %v283_v16 }
 0x221   :  { %v290_v18 = vmul.f32 0.1, %v288_v17  ;;  %vm289_vm3 = vcmp.gt.f32.partialorder %v288_v17, 0.0 }
 0x223   :  { %v291_v19 = vsel %vm289_vm3, %v288_v17, %v290_v18 }
 0x224   :  { %v292_v20 = vpack.c.bf16 %v291_v19, %v291_v19 }
 0x226   :  { %654 = vmatmul.mubr.bf16.vlgmr.msra.gmra.mxu0 %v292_v20 }
 0x2e6   :  { %v391_v29 = vpop.f32.mrf.mxu0 }
 0x2e7   :  { %v399_v30 = vrot.slane %v391_v29, 4 }
 0x2e8   :  { %v655_v31 = vpop.f32.mrf.mxu0 }
 0x2e9   :  { %v400_v32 = vadd.f32 %v399_v30, %v391_v29 }
 0x2ea   :  { %v394_v33 = vpop.f32.mrf.mxu0 }
 0x2eb   :  { %v401_v34 = vrot.slane %v400_v32, 2 }
 0x2ec   :  { %v656_v36 = vpop.f32.mrf.mxu0 }
 0x2ed   :  { %v402_v37 = vadd.f32 %v401_v34, %v400_v32 }
 0x2ef   :  { %v403_v38 = vrot.slane %v402_v37, 1 }
 0x2f1   :  { %v404_v39 = vadd.f32 %v403_v38, %v402_v37 }
 0x2f3   :  { %v405_v40 = vmul.f32 0.125, %v404_v39 }
 0x2f5   :  { %v406_v41 = vsub.f32 %v391_v29, %v405_v40 }
 0x2f7   :  { %v407_v42 = vmul.f32 %v406_v41, %v406_v41 }
 0x2f9   :  { %v408_v43 = vrot.slane %v407_v42, 4 }
 0x2fb   :  { %v409_v44 = vadd.f32 %v408_v43, %v407_v42 }
 0x2fd   :  { %v410_v45 = vrot.slane %v409_v44, 2 }
 0x2ff   :  { %v411_v46 = vadd.f32 %v410_v45, %v409_v44 }
 0x301   :  { %v412_v0 = vrot.slane %v411_v46, 1 }
 0x303   :  { %v413_v47 = vadd.f32 %v412_v0, %v411_v46 }
 0x305   :  { %v414_v48 = vmul.f32 0.125, %v413_v47 }
 0x307   :  { %v415_v49 = vadd.f32 1e-05, %v414_v48 }
 0x309   :  { %713 = vrsqrt.f32 %v415_v49 }
 0x316   :  { %v714_v51 = vpop.eup %713 }
 0x317   :  { %v417_v52 = vmul.f32 %v714_v51, %v397_v50 }
 0x319   :  { %v421_v53 = vrot.slane %v417_v52, %v858_v35 }
 0x31b   :  { %v422_v55 = vmul.f32 %v421_v53, %v406_v41 }
 0x31d   :  { %v427_v56 = vadd.f32 %v572_v54, %v422_v55 }
 0x31f   :  { %v429_v57 = vmul.f32 0.1, %v427_v56  ;;  %vm428_vm4 = vcmp.gt.f32.partialorder %v427_v56, 0.0 }
 0x321   :  { %v430_v58 = vsel %vm428_vm4, %v427_v56, %v429_v57 }
 0x322   :  { %v431_v59 = vpack.c.bf16 %v430_v58, %v430_v58 }
 0x324   :  { %674 = vmatmul.mubr.bf16.vlgmr.msra.gmra.mxu1 %v431_v59 }
 0x3e4   :  { %v535_v61 = vpop.f32.mrf.mxu1 }
 0x3e5   :  { %v536_v62 = vadd.f32 %v573_v60, %v535_v61 }
 0x3e6   :  { %v675_v63 = vpop.f32.mrf.mxu1 }
 0x3e7   :  { %v541_v1 = vmul.f32 0.5, %v536_v62 }
 0x3e8   :  { %v538_v35 = vpop.f32.mrf.mxu1 }
 0x3e9   :  { %715 = vtanh.f32 %v541_v1 }
 0x3ea   :  { %v676_v2 = vpop.f32.mrf.mxu1 }
 0x3f6   :  { %v716_v3 = vpop.eup %715 }
 0x3f7   :  { %v543_v4 = vmul.f32 0.5, %v716_v3 }
 0x3f9   :  { %v544_v5 = vadd.f32 0.5, %v543_v4 }
 0x3fb   :  { %545 = vst [vmem:[%s906_s6] sm:$0xff] %v544_v5 }
 0x3fc   :  { %550 = vsyncpa [#allocation3], 1 }
 0x3fd   :  { %551 = vsyncpa [#allocation5], 1 }

</bundles_post_ra>
